<compile_context>
chip_gen: v6e
topology: v6e:2x2x1
jax: 0.10.0
libtpu: 0.0.40
codegen_flags: <defaults>
</compile_context>

<pallas_src>
import jax
import jax.numpy as jnp
from jax.experimental import pallas as pl
from jax.experimental.pallas import tpu as pltpu

LANE = 128


def _round_up(v, m):
    return (v + m - 1) // m * m


def mlp_kernel(x_ref,
               w1_ref, b1_ref,
               w2_ref, b2_ref,
               w4_ref, b4_ref,
               w3_ref, b3_ref,
               o_ref):
    x = x_ref[...]

    # hidden_force = linear1(x)
    h1 = jnp.dot(x, w1_ref[...], preferred_element_type=jnp.float32) + b1_ref[...]

    # hidden_force2 = linear2(hidden_force).clamp(min=0)
    h2 = jnp.dot(h1, w2_ref[...], preferred_element_type=jnp.float32) + b2_ref[...]
    h2 = jnp.maximum(h2, 0.0)

    # hidden_force3 = linear4(hidden_force2)
    h3 = jnp.dot(h2, w4_ref[...], preferred_element_type=jnp.float32) + b4_ref[...]

    # predicted_force = linear3(hidden_force3)
    out = jnp.dot(h3, w3_ref[...], preferred_element_type=jnp.float32) + b3_ref[...]

    o_ref[...] = out.astype(o_ref.dtype)


def my_neural_net_forward(x, params, *, max_tile_n=512):
    """params: dict with w1,b1,w2,b2,w4,b4,w3,b3 (weights as (in, out))."""
    N, D_in = x.shape
    H = params["w1"].shape[1]
    D_out = params["w3"].shape[1]

    # Lane-dense padded feature dims.
    DP = _round_up(D_in, LANE)
    HP = _round_up(H, LANE)
    OP = _round_up(D_out, LANE)

    # Batch tile: sublane-aligned, capped so (x + out) double-buffered plus
    # intermediates stay well under the default scoped-VMEM limit on all gens.
    tile_n = min(max_tile_n, _round_up(N, 8))
    tile_n = _round_up(tile_n, 8)
    NP = _round_up(N, tile_n)

    # Pad once, outside the kernel.  Zero padding is exact: extra columns of
    # each W / b are zero so padded output lanes are zero; extra rows of each
    # W multiply zero-valued padded activation lanes.
    f32pad = lambda a, rows, cols: jnp.pad(a, ((0, rows), (0, cols)))
    xp = f32pad(x, NP - N, DP - D_in)
    w1 = f32pad(params["w1"], DP - D_in, HP - H)
    b1 = f32pad(params["b1"], 0, HP - H)
    w2 = f32pad(params["w2"], HP - H, HP - H)
    b2 = f32pad(params["b2"], 0, HP - H)
    w4 = f32pad(params["w4"], HP - H, HP - H)
    b4 = f32pad(params["b4"], 0, HP - H)
    w3 = f32pad(params["w3"], HP - H, OP - D_out)
    b3 = f32pad(params["b3"], 0, OP - D_out)

    grid = (NP // tile_n,)

    x_spec = pl.BlockSpec((tile_n, DP), lambda i: (i, 0))
    out_spec = pl.BlockSpec((tile_n, OP), lambda i: (i, 0))

    def resident(shape):
        # Same block every grid step -> DMA'd once, stays in VMEM.
        return pl.BlockSpec(shape, lambda i: (0, 0))

    itemsize = jnp.dtype(x.dtype).itemsize
    flops = 2 * NP * (DP * HP + 2 * HP * HP + HP * OP)
    bytes_accessed = (xp.size + NP * OP
                      + w1.size + w2.size + w3.size + w4.size
                      + b1.size + b2.size + b3.size + b4.size) * itemsize

    out_padded = pl.pallas_call(
        mlp_kernel,
        out_shape=jax.ShapeDtypeStruct((NP, OP), x.dtype),
        grid=grid,
        in_specs=[x_spec,
                  resident((DP, HP)), resident((1, HP)),
                  resident((HP, HP)), resident((1, HP)),
                  resident((HP, HP)), resident((1, HP)),
                  resident((HP, OP)), resident((1, OP))],
        out_specs=out_spec,
        compiler_params=pltpu.CompilerParams(
            dimension_semantics=("parallel",)),
        cost_estimate=pl.CostEstimate(
            flops=flops, transcendentals=0, bytes_accessed=bytes_accessed),
    )(xp, w1, b1, w2, b2, w4, b4, w3, b3)

    # Strip batch / lane padding outside the kernel.
    return out_padded[:N, :D_out]


def init_params(key, D_in, H, D_out, dtype=jnp.float32):
    """Deterministic init mimicking PyTorch Linear (uniform +/- 1/sqrt(fan_in)).
    Weights are stored transposed as (in_features, out_features)."""
    def linear(key, fan_in, fan_out):
        kw, kb = jax.random.split(key)
        bound = 1.0 / jnp.sqrt(jnp.array(fan_in, dtype))
        w = jax.random.uniform(kw, (fan_in, fan_out), dtype, -bound, bound)
        b = jax.random.uniform(kb, (1, fan_out), dtype, -bound, bound)
        return w, b

    k1, k2, k3, k4 = jax.random.split(key, 4)
    w1, b1 = linear(k1, D_in, H)    # linear1: D_in -> H
    w2, b2 = linear(k2, H, H)       # linear2: H -> H
    w3, b3 = linear(k3, H, D_out)   # linear3: H -> D_out
    w4, b4 = linear(k4, H, H)       # linear4: H -> H
    return dict(w1=w1, b1=b1, w2=w2, b2=b2, w3=w3, b3=b3, w4=w4, b4=b4)


if __name__ == "__main__":
    N, D_in, H, D_out = 8, 16, 32, 8

    key = jax.random.PRNGKey(0)
    kx, kp = jax.random.split(key)
    x = jax.random.normal(kx, (N, D_in), dtype=jnp.float32)
    params = init_params(kp, D_in, H, D_out)

    out = my_neural_net_forward(x, params)
    out = jax.block_until_ready(out)

    # Pure-JAX reference of the same math.
    h1 = x @ params["w1"] + params["b1"]
    h2 = jnp.maximum(h1 @ params["w2"] + params["b2"], 0.0)
    h3 = h2 @ params["w4"] + params["b4"]
    ref = h3 @ params["w3"] + params["b3"]
    assert out.shape == (N, D_out)
    assert jnp.allclose(out, ref, atol=1e-5, rtol=1e-5)

    print("KERNEL_OK")
</pallas_src>

<mosaic_0001>
module attributes {stable_mosaic.version = 11 : i64} {
  func.func @mlp_kernel(%arg0: i32, %arg1: memref<8x128xf32, #tpu.memory_space<vmem>>, %arg2: memref<128x128xf32, #tpu.memory_space<vmem>>, %arg3: memref<1x128xf32, #tpu.memory_space<vmem>>, %arg4: memref<128x128xf32, #tpu.memory_space<vmem>>, %arg5: memref<1x128xf32, #tpu.memory_space<vmem>>, %arg6: memref<128x128xf32, #tpu.memory_space<vmem>>, %arg7: memref<1x128xf32, #tpu.memory_space<vmem>>, %arg8: memref<128x128xf32, #tpu.memory_space<vmem>>, %arg9: memref<1x128xf32, #tpu.memory_space<vmem>>, %arg10: memref<8x128xf32, #tpu.memory_space<vmem>>) attributes {dimension_semantics = [#tpu.dimension_semantics<parallel>], iteration_bounds = array<i64: 1>, scalar_prefetch = 0 : i64, scratch_operands = 0 : i64, tpu.core_type = #tpu.core_type<tc>, window_params = [{transform_indices = @transform_0, window_bounds = array<i64: 8, 128>}, {pipeline_mode = #tpu.pipeline_mode<synchronous>, transform_indices = @transform_1, window_bounds = array<i64: 128, 128>}, {pipeline_mode = #tpu.pipeline_mode<synchronous>, transform_indices = @transform_2, window_bounds = array<i64: 1, 128>}, {pipeline_mode = #tpu.pipeline_mode<synchronous>, transform_indices = @transform_3, window_bounds = array<i64: 128, 128>}, {pipeline_mode = #tpu.pipeline_mode<synchronous>, transform_indices = @transform_4, window_bounds = array<i64: 1, 128>}, {pipeline_mode = #tpu.pipeline_mode<synchronous>, transform_indices = @transform_5, window_bounds = array<i64: 128, 128>}, {pipeline_mode = #tpu.pipeline_mode<synchronous>, transform_indices = @transform_6, window_bounds = array<i64: 1, 128>}, {pipeline_mode = #tpu.pipeline_mode<synchronous>, transform_indices = @transform_7, window_bounds = array<i64: 128, 128>}, {pipeline_mode = #tpu.pipeline_mode<synchronous>, transform_indices = @transform_8, window_bounds = array<i64: 1, 128>}, {transform_indices = @transform_9, window_bounds = array<i64: 8, 128>}]} {
    %c0 = arith.constant 0 : index
    %c0_0 = arith.constant 0 : index
    %0 = vector.load %arg1[%c0, %c0_0] : memref<8x128xf32, #tpu.memory_space<vmem>>, vector<8x128xf32>
    %c0_1 = arith.constant 0 : index
    %c0_2 = arith.constant 0 : index
    %1 = vector.load %arg2[%c0_1, %c0_2] : memref<128x128xf32, #tpu.memory_space<vmem>>, vector<128x128xf32>
    %cst = arith.constant dense<0.000000e+00> : vector<8x128xf32>
    %2 = tpu.matmul %0, %1, %cst {dimension_numbers = #tpu.dot_dimension_numbers<[1], [0], [0], [1], [0, 0, 1, 1], [], []>} : vector<8x128xf32>, vector<128x128xf32>, vector<8x128xf32> -> vector<8x128xf32>
    %c0_3 = arith.constant 0 : index
    %c0_4 = arith.constant 0 : index
    %3 = vector.load %arg3[%c0_3, %c0_4] : memref<1x128xf32, #tpu.memory_space<vmem>>, vector<1x128xf32>
    %4 = vector.broadcast %3 : vector<1x128xf32> to vector<8x128xf32>
    %5 = arith.addf %2, %4 : vector<8x128xf32>
    %c0_5 = arith.constant 0 : index
    %c0_6 = arith.constant 0 : index
    %6 = vector.load %arg4[%c0_5, %c0_6] : memref<128x128xf32, #tpu.memory_space<vmem>>, vector<128x128xf32>
    %cst_7 = arith.constant dense<0.000000e+00> : vector<8x128xf32>
    %7 = tpu.matmul %5, %6, %cst_7 {dimension_numbers = #tpu.dot_dimension_numbers<[1], [0], [0], [1], [0, 0, 1, 1], [], []>} : vector<8x128xf32>, vector<128x128xf32>, vector<8x128xf32> -> vector<8x128xf32>
    %c0_8 = arith.constant 0 : index
    %c0_9 = arith.constant 0 : index
    %8 = vector.load %arg5[%c0_8, %c0_9] : memref<1x128xf32, #tpu.memory_space<vmem>>, vector<1x128xf32>
    %9 = vector.broadcast %8 : vector<1x128xf32> to vector<8x128xf32>
    %10 = arith.addf %7, %9 : vector<8x128xf32>
    %cst_10 = arith.constant 0.000000e+00 : f32
    %11 = vector.broadcast %cst_10 : f32 to vector<8x128xf32>
    %12 = arith.maximumf %10, %11 : vector<8x128xf32>
    %c0_11 = arith.constant 0 : index
    %c0_12 = arith.constant 0 : index
    %13 = vector.load %arg6[%c0_11, %c0_12] : memref<128x128xf32, #tpu.memory_space<vmem>>, vector<128x128xf32>
    %cst_13 = arith.constant dense<0.000000e+00> : vector<8x128xf32>
    %14 = tpu.matmul %12, %13, %cst_13 {dimension_numbers = #tpu.dot_dimension_numbers<[1], [0], [0], [1], [0, 0, 1, 1], [], []>} : vector<8x128xf32>, vector<128x128xf32>, vector<8x128xf32> -> vector<8x128xf32>
    %c0_14 = arith.constant 0 : index
    %c0_15 = arith.constant 0 : index
    %15 = vector.load %arg7[%c0_14, %c0_15] : memref<1x128xf32, #tpu.memory_space<vmem>>, vector<1x128xf32>
    %16 = vector.broadcast %15 : vector<1x128xf32> to vector<8x128xf32>
    %17 = arith.addf %14, %16 : vector<8x128xf32>
    %c0_16 = arith.constant 0 : index
    %c0_17 = arith.constant 0 : index
    %18 = vector.load %arg8[%c0_16, %c0_17] : memref<128x128xf32, #tpu.memory_space<vmem>>, vector<128x128xf32>
    %cst_18 = arith.constant dense<0.000000e+00> : vector<8x128xf32>
    %19 = tpu.matmul %17, %18, %cst_18 {dimension_numbers = #tpu.dot_dimension_numbers<[1], [0], [0], [1], [0, 0, 1, 1], [], []>} : vector<8x128xf32>, vector<128x128xf32>, vector<8x128xf32> -> vector<8x128xf32>
    %c0_19 = arith.constant 0 : index
    %c0_20 = arith.constant 0 : index
    %20 = vector.load %arg9[%c0_19, %c0_20] : memref<1x128xf32, #tpu.memory_space<vmem>>, vector<1x128xf32>
    %21 = vector.broadcast %20 : vector<1x128xf32> to vector<8x128xf32>
    %22 = arith.addf %19, %21 : vector<8x128xf32>
    %c0_21 = arith.constant 0 : index
    %c0_22 = arith.constant 0 : index
    %23 = vector.load %arg10[%c0_21, %c0_22] : memref<8x128xf32, #tpu.memory_space<vmem>>, vector<8x128xf32>
    tpu.vector_store %arg10[%c0_21, %c0_22], %22 {strides = array<i32>} : memref<8x128xf32, #tpu.memory_space<vmem>>, vector<8x128xf32>,
    return
  }
  func.func @transform_0(%arg0: i32) -> (i32, i32) {
    %c0_i32 = arith.constant 0 : i32
    %c0_i32_0 = arith.constant 0 : i32
    return %arg0, %c0_i32 : i32, i32
  }
  func.func @transform_1(%arg0: i32) -> (i32, i32) {
    %c0_i32 = arith.constant 0 : i32
    %c0_i32_0 = arith.constant 0 : i32
    %c0_i32_1 = arith.constant 0 : i32
    return %c0_i32, %c0_i32_0 : i32, i32
  }
  func.func @transform_2(%arg0: i32) -> (i32, i32) {
    %c0_i32 = arith.constant 0 : i32
    %c0_i32_0 = arith.constant 0 : i32
    %c0_i32_1 = arith.constant 0 : i32
    return %c0_i32, %c0_i32_0 : i32, i32
  }
  func.func @transform_3(%arg0: i32) -> (i32, i32) {
    %c0_i32 = arith.constant 0 : i32
    %c0_i32_0 = arith.constant 0 : i32
    %c0_i32_1 = arith.constant 0 : i32
    return %c0_i32, %c0_i32_0 : i32, i32
  }
  func.func @transform_4(%arg0: i32) -> (i32, i32) {
    %c0_i32 = arith.constant 0 : i32
    %c0_i32_0 = arith.constant 0 : i32
    %c0_i32_1 = arith.constant 0 : i32
    return %c0_i32, %c0_i32_0 : i32, i32
  }
  func.func @transform_5(%arg0: i32) -> (i32, i32) {
    %c0_i32 = arith.constant 0 : i32
    %c0_i32_0 = arith.constant 0 : i32
    %c0_i32_1 = arith.constant 0 : i32
    return %c0_i32, %c0_i32_0 : i32, i32
  }
  func.func @transform_6(%arg0: i32) -> (i32, i32) {
    %c0_i32 = arith.constant 0 : i32
    %c0_i32_0 = arith.constant 0 : i32
    %c0_i32_1 = arith.constant 0 : i32
    return %c0_i32, %c0_i32_0 : i32, i32
  }
  func.func @transform_7(%arg0: i32) -> (i32, i32) {
    %c0_i32 = arith.constant 0 : i32
    %c0_i32_0 = arith.constant 0 : i32
    %c0_i32_1 = arith.constant 0 : i32
    return %c0_i32, %c0_i32_0 : i32, i32
  }
  func.func @transform_8(%arg0: i32) -> (i32, i32) {
    %c0_i32 = arith.constant 0 : i32
    %c0_i32_0 = arith.constant 0 : i32
    %c0_i32_1 = arith.constant 0 : i32
    return %c0_i32, %c0_i32_0 : i32, i32
  }
  func.func @transform_9(%arg0: i32) -> (i32, i32) {
    %c0_i32 = arith.constant 0 : i32
    %c0_i32_0 = arith.constant 0 : i32
    return %arg0, %c0_i32 : i32, i32
  }
}

</mosaic_0001>

<bundles_post_ra>
// kernel: tpu_custom_call.1
= control target key start
LH: loop header
LB: loop body
LE: loop exit
PB: predicated region body
PF: predicated region fallthrough
CT: control target
= control target key end

     0   :  { %14 = vsyncpa [#allocation3], 0  ;;  %s1015_s0 = inlined_call_operand.hbm [shape: f32[8,128], index: 0, kind: input, shape index: {}]   ;;  %s1016_s1 = inlined_call_operand.hbm [shape: f32[128,128], index: 1, kind: input, shape index: {}]   ;;  %s1017_s2 = inlined_call_operand.vmem [shape: f32[1,128], index: 2, kind: input, shape index: {}]   ;;  %s1018_s3 = inlined_call_operand.hbm [shape: f32[128,128], index: 3, kind: input, shape index: {}]   ;;  %s1019_s4 = inlined_call_operand.vmem [shape: f32[1,128], index: 4, kind: input, shape index: {}]   ;;  %s1020_s5 = inlined_call_operand.hbm [shape: f32[128,128], index: 5, kind: input, shape index: {}]   ;;  %s1021_s6 = inlined_call_operand.vmem [shape: f32[1,128], index: 6, kind: input, shape index: {}]   ;;  %s1022_s7 = inlined_call_operand.hbm [shape: f32[128,128], index: 7, kind: input, shape index: {}]   ;;  %s1023_s8 = inlined_call_operand.vmem [shape: f32[1,128], index: 8, kind: input, shape index: {}]   ;;  %s1024_s9 = inlined_call_operand.hbm [shape: f32[8,128], index: 9, kind: output, shape index: {}]  }
   0x1   :  { %15 = vsyncpa [#allocation6], 0 }
   0x2   :  { %16 = vsyncpa [#allocation9], 0 }
   0x3   :  { %17 = vsyncpa [#allocation4], 0  ;;  %s841_s30 = smov [#allocation5]  }
   0x4   :  { %s33_s10 = sshll.u32 %s841_s30, 4  ;;  %s34_s10 = int_to_ptr.vmem [resolvable:$true] %s33_s10 }
   0x5   :  { %s721_s11 = scalar_lea.vmem %s34_s10, 2048  ;;  %p726_p1 = scmp.lt.s32.totalorder %s34_s10, %s34_s10 }
   0x6   :  { %p722_p0 = scmp.ne.s32.totalorder %s34_s10, %s721_s11  ;;  %p727_p2 = scmp.lt.s32.totalorder %s721_s11, %s721_s11 }
   0x8   :  { %p728_p3 = por %p727_p2, %p726_p1 }
   0xa   :  { %p729_p4 = pnand %p728_p3, %p722_p0 }
   0xc   :  { %732 = shalt.err (!%p729_p4)
}
   0xd   :  { %s842_s12 = smov 128   ;;  %s843_s13 = smov 8  }
   0xe   :  { %39 = dma.hbm_to_vmem [thread:$0]  %s1016_s1, 2048, %s34_s10, [#allocation6], %s842_s12, %s842_s12, %s843_s13  }
   0xf   :  { %s844_s16 = smov [#allocation8]   ;;  %s845_s18 = smov [#allocation2]  }
  0x10   :  { %s61_s17 = sshll.u32 %s844_s16, 4  ;;  %s24_s19 = sshll.u32 %s845_s18, 4  ;;  %s62_s17 = int_to_ptr.vmem [resolvable:$true] %s61_s17  ;;  %s25_s19 = int_to_ptr.vmem [resolvable:$true] %s24_s19 }
  0x11   :  { %s741_s20 = scalar_lea.vmem %s62_s17, 2048  ;;  %p746_p6 = scmp.lt.s32.totalorder %s62_s17, %s62_s17 }
  0x12   :  { %p742_p5 = scmp.ne.s32.totalorder %s62_s17, %s741_s20  ;;  %p747_p7 = scmp.lt.s32.totalorder %s741_s20, %s741_s20 }
  0x14   :  { %p748_p8 = por %p747_p7, %p746_p6 }
  0x16   :  { %p749_p9 = pnand %p748_p8, %p742_p5 }
  0x18   :  { %752 = shalt.err (!%p749_p9)
}
  0x19   :  { %67 = dma.hbm_to_vmem [thread:$0]  %s1020_s5, 2048, %s62_s17, [#allocation9], %s842_s12, %s842_s12, %s843_s13  }
  0x1a   :  { %s761_s1 = scalar_lea.vmem %s25_s19, 128  ;;  %p766_p11 = scmp.lt.s32.totalorder %s25_s19, %s25_s19 }
  0x1b   :  { %p762_p10 = scmp.ne.s32.totalorder %s25_s19, %s761_s1  ;;  %p767_p12 = scmp.lt.s32.totalorder %s761_s1, %s761_s1 }
  0x1d   :  { %p768_p13 = por %p767_p12, %p766_p11 }
  0x1f   :  { %p769_p0 = pnand %p768_p13, %p762_p10 }
  0x21   :  { %772 = shalt.err (!%p769_p0)
}
  0x22   :  { %27 = dma.hbm_to_vmem [thread:$0]  %s1015_s0, 128, %s25_s19, [#allocation3]  }
  0x23   :  { %s846_s25 = smov [#allocation7]   ;;  %s847_s27 = smov [#allocation10]  }
  0x24   :  { %s47_s26 = sshll.u32 %s846_s25, 4  ;;  %s75_s28 = sshll.u32 %s847_s27, 4  ;;  %s48_s26 = int_to_ptr.vmem [resolvable:$true] %s47_s26  ;;  %s76_s28 = int_to_ptr.vmem [resolvable:$true] %s75_s28 }
  0x25   :  { %s781_s29 = scalar_lea.vmem %s48_s26, 2048  ;;  %p786_p2 = scmp.lt.s32.totalorder %s48_s26, %s48_s26 }
  0x26   :  { %p782_p1 = scmp.ne.s32.totalorder %s48_s26, %s781_s29  ;;  %p787_p3 = scmp.lt.s32.totalorder %s781_s29, %s781_s29 }
  0x28   :  { %p788_p4 = por %p787_p3, %p786_p2 }
  0x2a   :  { %p789_p5 = pnand %p788_p4, %p782_p1 }
  0x2c   :  { %792 = shalt.err (!%p789_p5)
}
  0x2d   :  { %53 = dma.hbm_to_vmem [thread:$0]  %s1018_s3, 2048, %s48_s26, [#allocation6], %s842_s12, %s842_s12, %s843_s13  }
  0x2e   :  { %s801_s0 = scalar_lea.vmem %s76_s28, 2048  ;;  %p806_p7 = scmp.lt.s32.totalorder %s76_s28, %s76_s28 }
  0x2f   :  { %p802_p6 = scmp.ne.s32.totalorder %s76_s28, %s801_s0  ;;  %p807_p8 = scmp.lt.s32.totalorder %s801_s0, %s801_s0 }
  0x31   :  { %p808_p9 = por %p807_p8, %p806_p7 }
  0x33   :  { %p809_p10 = pnand %p808_p9, %p802_p6 }
  0x35   :  { %812 = shalt.err (!%p809_p10)
}
  0x36   :  { %81 = dma.hbm_to_vmem [thread:$0]  %s1022_s7, 2048, %s76_s28, [#allocation9], %s842_s12, %s842_s12, %s843_s13  }
  0x37   :  { %833 = dma.done.wait [#allocation3], 128  }
  0x38   :  { %834 = vsyncadd [#allocation3], 4294967168 }
  0x39   :  { %835 = dma.done.wait [#allocation6], 4096  }
  0x3a   :  { %836 = vsyncadd [#allocation6], 4294963200 }
  0x3b   :  { %837 = dma.done.wait [#allocation9], 4096  }
  0x3c   :  { %838 = vsyncadd [#allocation9], 4294963200  ;;  %v848_v0 = vmov 0.0   ;;  %vm849_vm0 = vmmov 0   ;;  %v115_v1 = vld [vmem:[#allocation5 + $0x78] sm:$0xff]  ;;  %v114_v2 = vld [vmem:[#allocation5 + $0x70] sm:$0xff] }
  0x3d   :  { %563 = vmatprep.subr.mxu0 %v848_v0  ;;  %595 = vmatprep.mubr.msk.f32.mxu0 %vm849_vm0, %v848_v0  ;;  %v113_v3 = vld [vmem:[#allocation5 + $0x68] sm:$0xff]  ;;  %v112_v4 = vld [vmem:[#allocation5 + $0x60] sm:$0xff]  ;;  %v208_v5 = vld [vmem:[#allocation7 + $0x78] sm:$0xff]  ;;  %s850_s16 = smov [#allocation11]  }
  0x3e   :  { %598 = vmatprep.subr.mxu1 %v848_v0  ;;  %630 = vmatprep.mubr.msk.f32.mxu1 %vm849_vm0, %v848_v0  ;;  %v111_v6 = vld [vmem:[#allocation5 + $0x58] sm:$0xff]  ;;  %v207_v7 = vld [vmem:[#allocation7 + $0x70] sm:$0xff]  ;;  %v206_v8 = vld [vmem:[#allocation7 + $0x68] sm:$0xff]  ;;  %s480_s17 = sshll.u32 %s850_s16, 4  ;;  %s481_s17 = int_to_ptr.vmem [resolvable:$true] %s480_s17 }
  0x3f   :  { %564 = vmatpush3.msra.mxu0 %v115_v1  ;;  %599 = vmatpush3.msra.mxu1 %v208_v5  ;;  %v110_v9 = vld [vmem:[#allocation5 + $0x50] sm:$0xff]  ;;  %v205_v10 = vld [vmem:[#allocation7 + $0x60] sm:$0xff]  ;;  %v109_v11 = vld [vmem:[#allocation5 + $0x48] sm:$0xff]  ;;  %s813_s18 = scalar_lea.vmem %s481_s17, 128  ;;  %p818_p12 = scmp.lt.s32.totalorder %s481_s17, %s481_s17 }
  0x40   :  { %565 = vmatprep.subr.mxu0 %v848_v0  ;;  %600 = vmatprep.subr.mxu1 %v848_v0  ;;  %v204_v12 = vld [vmem:[#allocation7 + $0x58] sm:$0xff]  ;;  %v108_v13 = vld [vmem:[#allocation5 + $0x40] sm:$0xff]  ;;  %v203_v14 = vld [vmem:[#allocation7 + $0x50] sm:$0xff]  ;;  %p814_p11 = scmp.ne.s32.totalorder %s481_s17, %s813_s18  ;;  %p819_p13 = scmp.lt.s32.totalorder %s813_s18, %s813_s18 }
  0x41   :  { %566 = vmatpush3.msra.mxu0 %v114_v2  ;;  %601 = vmatpush3.msra.mxu1 %v207_v7  ;;  %v107_v15 = vld [vmem:[#allocation5 + $0x38] sm:$0xff]  ;;  %v202_v16 = vld [vmem:[#allocation7 + $0x48] sm:$0xff]  ;;  %v106_v17 = vld [vmem:[#allocation5 + $0x30] sm:$0xff] }
  0x42   :  { %567 = vmatprep.subr.mxu0 %v848_v0  ;;  %602 = vmatprep.subr.mxu1 %v848_v0  ;;  %v201_v18 = vld [vmem:[#allocation7 + $0x40] sm:$0xff]  ;;  %v105_v19 = vld [vmem:[#allocation5 + $0x28] sm:$0xff]  ;;  %v200_v20 = vld [vmem:[#allocation7 + $0x38] sm:$0xff]  ;;  %p820_p0 = por %p819_p13, %p818_p12 }
  0x43   :  { %568 = vmatpush3.msra.mxu0 %v113_v3  ;;  %603 = vmatpush3.msra.mxu1 %v206_v8  ;;  %v104_v21 = vld [vmem:[#allocation5 + $0x20] sm:$0xff]  ;;  %v199_v22 = vld [vmem:[#allocation7 + $0x30] sm:$0xff]  ;;  %v103_v23 = vld [vmem:[#allocation5 + $0x18] sm:$0xff] }
  0x44   :  { %569 = vmatprep.subr.mxu0 %v848_v0  ;;  %604 = vmatprep.subr.mxu1 %v848_v0  ;;  %v198_v24 = vld [vmem:[#allocation7 + $0x28] sm:$0xff]  ;;  %v102_v25 = vld [vmem:[#allocation5 + $0x10] sm:$0xff]  ;;  %v197_v26 = vld [vmem:[#allocation7 + $0x20] sm:$0xff]  ;;  %p821_p1 = pnand %p820_p0, %p814_p11 }
  0x45   :  { %570 = vmatpush3.msra.mxu0 %v112_v4  ;;  %605 = vmatpush3.msra.mxu1 %v205_v10  ;;  %v101_v27 = vld [vmem:[#allocation5 + $0x8] sm:$0xff]  ;;  %v196_v28 = vld [vmem:[#allocation7 + $0x18] sm:$0xff]  ;;  %v100_v29 = vld [vmem:[#allocation5] sm:$0xff] }
  0x46   :  { %571 = vmatprep.subr.mxu0 %v848_v0  ;;  %606 = vmatprep.subr.mxu1 %v848_v0  ;;  %v99_v30 = vld [vmem:[#allocation2] sm:$0xff]  ;;  %v195_v31 = vld [vmem:[#allocation7 + $0x10] sm:$0xff]  ;;  %v194_v32 = vld [vmem:[#allocation7 + $0x8] sm:$0xff] }
  0x47   :  { %572 = vmatpush3.msra.mxu0 %v111_v6  ;;  %607 = vmatpush3.msra.mxu1 %v204_v12  ;;  %v193_v33 = vld [vmem:[#allocation7] sm:$0xff]  ;;  %v302_v34 = vld [vmem:[#allocation8 + $0x78] sm:$0xff]  ;;  %v301_v35 = vld [vmem:[#allocation8 + $0x70] sm:$0xff] }
  0x48   :  { %573 = vmatprep.subr.mxu0 %v848_v0  ;;  %608 = vmatprep.subr.mxu1 %v848_v0  ;;  %v300_v36 = vld [vmem:[#allocation8 + $0x68] sm:$0xff]  ;;  %v299_v37 = vld [vmem:[#allocation8 + $0x60] sm:$0xff]  ;;  %v298_v38 = vld [vmem:[#allocation8 + $0x58] sm:$0xff] }
  0x49   :  { %574 = vmatpush3.msra.mxu0 %v110_v9  ;;  %609 = vmatpush3.msra.mxu1 %v203_v14  ;;  %v297_v39 = vld [vmem:[#allocation8 + $0x50] sm:$0xff]  ;;  %v296_v40 = vld [vmem:[#allocation8 + $0x48] sm:$0xff]  ;;  %v295_v41 = vld [vmem:[#allocation8 + $0x40] sm:$0xff] }
  0x4a   :  { %575 = vmatprep.subr.mxu0 %v848_v0  ;;  %610 = vmatprep.subr.mxu1 %v848_v0  ;;  %v294_v42 = vld [vmem:[#allocation8 + $0x38] sm:$0xff]  ;;  %v293_v43 = vld [vmem:[#allocation8 + $0x30] sm:$0xff]  ;;  %v292_v44 = vld [vmem:[#allocation8 + $0x28] sm:$0xff] }
  0x4b   :  { %576 = vmatpush3.msra.mxu0 %v109_v11  ;;  %611 = vmatpush3.msra.mxu1 %v202_v16  ;;  %v291_v45 = vld [vmem:[#allocation8 + $0x20] sm:$0xff]  ;;  %v290_v46 = vld [vmem:[#allocation8 + $0x18] sm:$0xff]  ;;  %v289_v51 = vld [vmem:[#allocation8 + $0x10] sm:$0xff] }
  0x4c   :  { %577 = vmatprep.subr.mxu0 %v848_v0  ;;  %612 = vmatprep.subr.mxu1 %v848_v0  ;;  %v491_v47 = vld [vmem:[%s1017_s2] ss:$0 sm:$0xff]  ;;  %v288_v52 = vld [vmem:[#allocation8 + $0x8] sm:$0xff]  ;;  %v287_v53 = vld [vmem:[#allocation8] sm:$0xff] }
  0x4d   :  { %578 = vmatpush3.msra.mxu0 %v108_v13  ;;  %613 = vmatpush3.msra.mxu1 %v201_v18  ;;  %v395_v54 = vld [vmem:[#allocation10 + $0x78] sm:$0xff]  ;;  %v394_v55 = vld [vmem:[#allocation10 + $0x70] sm:$0xff]  ;;  %v393_v56 = vld [vmem:[#allocation10 + $0x68] sm:$0xff] }
  0x4e   :  { %579 = vmatprep.subr.mxu0 %v848_v0  ;;  %614 = vmatprep.subr.mxu1 %v848_v0  ;;  %v392_v57 = vld [vmem:[#allocation10 + $0x60] sm:$0xff]  ;;  %v391_v58 = vld [vmem:[#allocation10 + $0x58] sm:$0xff]  ;;  %v390_v59 = vld [vmem:[#allocation10 + $0x50] sm:$0xff] }
  0x4f   :  { %580 = vmatpush3.msra.mxu0 %v107_v15  ;;  %615 = vmatpush3.msra.mxu1 %v200_v20  ;;  %v389_v60 = vld [vmem:[#allocation10 + $0x48] sm:$0xff]  ;;  %v388_v61 = vld [vmem:[#allocation10 + $0x40] sm:$0xff]  ;;  %v387_v62 = vld [vmem:[#allocation10 + $0x38] sm:$0xff] }
  0x50   :  { %581 = vmatprep.subr.mxu0 %v848_v0  ;;  %616 = vmatprep.subr.mxu1 %v848_v0  ;;  %v386_v63 = vld [vmem:[#allocation10 + $0x30] sm:$0xff]  ;;  %v385_v1 = vld [vmem:[#allocation10 + $0x28] sm:$0xff]  ;;  %v384_v2 = vld [vmem:[#allocation10 + $0x20] sm:$0xff] }
  0x51   :  { %582 = vmatpush3.msra.mxu0 %v106_v17  ;;  %617 = vmatpush3.msra.mxu1 %v199_v22  ;;  %v383_v3 = vld [vmem:[#allocation10 + $0x18] sm:$0xff]  ;;  %v382_v4 = vld [vmem:[#allocation10 + $0x10] sm:$0xff]  ;;  %v381_v10 = vld [vmem:[#allocation10 + $0x8] sm:$0xff] }
  0x52   :  { %583 = vmatprep.subr.mxu0 %v848_v0  ;;  %618 = vmatprep.subr.mxu1 %v848_v0  ;;  %v492_v5 = vld [vmem:[%s1019_s4] ss:$0 sm:$0xff]  ;;  %v380_v11 = vld [vmem:[#allocation10] sm:$0xff] }
  0x53   :  { %584 = vmatpush3.msra.mxu0 %v105_v19  ;;  %619 = vmatpush3.msra.mxu1 %v198_v24  ;;  %v493_v12 = vld [vmem:[%s1021_s6] ss:$0 sm:$0xff] }
  0x54   :  { %585 = vmatprep.subr.mxu0 %v848_v0  ;;  %620 = vmatprep.subr.mxu1 %v848_v0  ;;  %v494_v16 = vld [vmem:[%s1023_s8] ss:$0 sm:$0xff] }
  0x55   :  { %586 = vmatpush3.msra.mxu0 %v104_v21  ;;  %621 = vmatpush3.msra.mxu1 %v197_v26 }
  0x56   :  { %587 = vmatprep.subr.mxu0 %v848_v0  ;;  %622 = vmatprep.subr.mxu1 %v848_v0 }
  0x57   :  { %588 = vmatpush3.msra.mxu0 %v103_v23  ;;  %623 = vmatpush3.msra.mxu1 %v196_v28 }
  0x58   :  { %589 = vmatprep.subr.mxu0 %v848_v0  ;;  %624 = vmatprep.subr.mxu1 %v848_v0 }
  0x59   :  { %590 = vmatpush3.msra.mxu0 %v102_v25  ;;  %625 = vmatpush3.msra.mxu1 %v195_v31 }
  0x5a   :  { %591 = vmatprep.subr.mxu0 %v848_v0  ;;  %626 = vmatprep.subr.mxu1 %v848_v0 }
  0x5b   :  { %592 = vmatpush3.msra.mxu0 %v101_v27  ;;  %627 = vmatpush3.msra.mxu1 %v194_v32 }
  0x5c   :  { %593 = vmatprep.subr.mxu0 %v848_v0  ;;  %628 = vmatprep.subr.mxu1 %v848_v0 }
  0x5d   :  { %594 = vmatpush3.msra.mxu0 %v100_v29  ;;  %629 = vmatpush3.msra.mxu1 %v193_v33 }
  0x5e   :  { %596 = vmatmul.mubr.f32.vlgmr.msra.gmra.mxu0 %v99_v30  ;;  %633 = vmatprep.subr.mxu0 %v848_v0 }
  0x5f   :  { %665 = vmatprep.mubr.msk.f32.mxu0 %vm849_vm0, %v848_v0  ;;  %668 = vmatprep.subr.mxu1 %v848_v0 }
  0x60   :  { %634 = vmatpush3.msra.mxu0 %v302_v34 }
  0x61   :  { %635 = vmatprep.subr.mxu0 %v848_v0 }
  0x62   :  { %636 = vmatpush3.msra.mxu0 %v301_v35 }
  0x63   :  { %637 = vmatprep.subr.mxu0 %v848_v0 }
  0x64   :  { %638 = vmatpush3.msra.mxu0 %v300_v36 }
  0x65   :  { %639 = vmatprep.subr.mxu0 %v848_v0 }
  0x66   :  { %640 = vmatpush3.msra.mxu0 %v299_v37 }
  0x67   :  { %641 = vmatprep.subr.mxu0 %v848_v0 }
  0x68   :  { %642 = vmatpush3.msra.mxu0 %v298_v38 }
  0x69   :  { %643 = vmatprep.subr.mxu0 %v848_v0 }
  0x6a   :  { %644 = vmatpush3.msra.mxu0 %v297_v39 }
  0x6b   :  { %645 = vmatprep.subr.mxu0 %v848_v0 }
  0x6c   :  { %646 = vmatpush3.msra.mxu0 %v296_v40 }
  0x6d   :  { %647 = vmatprep.subr.mxu0 %v848_v0 }
  0x6e   :  { %648 = vmatpush3.msra.mxu0 %v295_v41 }
  0x6f   :  { %649 = vmatprep.subr.mxu0 %v848_v0 }
  0x70   :  { %650 = vmatpush3.msra.mxu0 %v294_v42 }
  0x71   :  { %651 = vmatprep.subr.mxu0 %v848_v0 }
  0x72   :  { %652 = vmatpush3.msra.mxu0 %v293_v43 }
  0x73   :  { %653 = vmatprep.subr.mxu0 %v848_v0 }
  0x74   :  { %654 = vmatpush3.msra.mxu0 %v292_v44 }
  0x75   :  { %655 = vmatprep.subr.mxu0 %v848_v0 }
  0x76   :  { %656 = vmatpush3.msra.mxu0 %v291_v45 }
  0x77   :  { %657 = vmatprep.subr.mxu0 %v848_v0 }
  0x78   :  { %658 = vmatpush3.msra.mxu0 %v290_v46 }
  0x79   :  { %659 = vmatprep.subr.mxu0 %v848_v0 }
  0x7a   :  { %660 = vmatpush3.msra.mxu0 %v289_v51 }
  0x7b   :  { %661 = vmatprep.subr.mxu0 %v848_v0 }
  0x7c   :  { %662 = vmatpush3.msra.mxu0 %v288_v52 }
  0x7d   :  { %663 = vmatprep.subr.mxu0 %v848_v0 }
  0x7e   :  { %664 = vmatpush3.msra.mxu0 %v287_v53 }
 0x11e   :  { %v189_v48 = vpop.f32.mrf.mxu0 }
 0x11f   :  { %v190_v49 = vadd.f32 %v491_v47, %v189_v48 }
 0x120   :  { %v597_v50 = vpop.f32.mrf.mxu0 }
 0x121   :  { %631 = vmatmul.mubr.f32.vlgmr.msra.gmra.mxu1 %v190_v49 }
 0x122   :  { %700 = vmatprep.mubr.msk.f32.mxu1 %vm849_vm0, %v848_v0  ;;  %669 = vmatpush3.msra.mxu1 %v395_v54 }
 0x123   :  { %670 = vmatprep.subr.mxu1 %v848_v0 }
 0x124   :  { %671 = vmatpush3.msra.mxu1 %v394_v55 }
 0x125   :  { %672 = vmatprep.subr.mxu1 %v848_v0 }
 0x126   :  { %673 = vmatpush3.msra.mxu1 %v393_v56 }
 0x127   :  { %674 = vmatprep.subr.mxu1 %v848_v0 }
 0x128   :  { %675 = vmatpush3.msra.mxu1 %v392_v57 }
 0x129   :  { %676 = vmatprep.subr.mxu1 %v848_v0 }
 0x12a   :  { %677 = vmatpush3.msra.mxu1 %v391_v58 }
 0x12b   :  { %678 = vmatprep.subr.mxu1 %v848_v0 }
 0x12c   :  { %679 = vmatpush3.msra.mxu1 %v390_v59 }
 0x12d   :  { %680 = vmatprep.subr.mxu1 %v848_v0 }
 0x12e   :  { %681 = vmatpush3.msra.mxu1 %v389_v60 }
 0x12f   :  { %682 = vmatprep.subr.mxu1 %v848_v0 }
 0x130   :  { %683 = vmatpush3.msra.mxu1 %v388_v61 }
 0x131   :  { %684 = vmatprep.subr.mxu1 %v848_v0 }
 0x132   :  { %685 = vmatpush3.msra.mxu1 %v387_v62 }
 0x133   :  { %686 = vmatprep.subr.mxu1 %v848_v0 }
 0x134   :  { %687 = vmatpush3.msra.mxu1 %v386_v63 }
 0x135   :  { %688 = vmatprep.subr.mxu1 %v848_v0 }
 0x136   :  { %689 = vmatpush3.msra.mxu1 %v385_v1 }
 0x137   :  { %690 = vmatprep.subr.mxu1 %v848_v0 }
 0x138   :  { %691 = vmatpush3.msra.mxu1 %v384_v2 }
 0x139   :  { %692 = vmatprep.subr.mxu1 %v848_v0 }
 0x13a   :  { %693 = vmatpush3.msra.mxu1 %v383_v3 }
 0x13b   :  { %694 = vmatprep.subr.mxu1 %v848_v0 }
 0x13c   :  { %695 = vmatpush3.msra.mxu1 %v382_v4 }
 0x13d   :  { %696 = vmatprep.subr.mxu1 %v848_v0 }
 0x13e   :  { %697 = vmatpush3.msra.mxu1 %v381_v10 }
 0x13f   :  { %698 = vmatprep.subr.mxu1 %v848_v0 }
 0x140   :  { %699 = vmatpush3.msra.mxu1 %v380_v11 }
 0x1e1   :  { %v282_v6 = vpop.f32.mrf.mxu1 }
 0x1e2   :  { %v283_v7 = vadd.f32 %v492_v5, %v282_v6 }
 0x1e3   :  { %v632_v8 = vpop.f32.mrf.mxu1 }
 0x1e4   :  { %v286_v9 = vmax.f32 %v283_v7, 0.0 }
 0x1e6   :  { %666 = vmatmul.mubr.f32.vlgmr.msra.gmra.mxu0 %v286_v9 }
 0x2a6   :  { %v376_v13 = vpop.f32.mrf.mxu0 }
 0x2a7   :  { %v377_v14 = vadd.f32 %v493_v12, %v376_v13 }
 0x2a8   :  { %v667_v15 = vpop.f32.mrf.mxu0 }
 0x2a9   :  { %701 = vmatmul.mubr.f32.vlgmr.msra.gmra.mxu1 %v377_v14 }
 0x369   :  { %v469_v17 = vpop.f32.mrf.mxu1 }
 0x36a   :  { %v470_v18 = vadd.f32 %v494_v16, %v469_v17 }
 0x36b   :  { %v702_v0 = vpop.f32.mrf.mxu1 }
 0x36c   :  { %473 = vst [vmem:[#allocation11] sm:$0xff] %v470_v18 }
 0x36d   :  { %824 = shalt.err (!%p821_p1)
}
 0x36e   :  { %483 = dma.vmem_to_hbm [thread:$0]  %s481_s17, 128, %s1024_s9, [#allocation4]  }
 0x36f   :  { %839 = dma.done.wait [#allocation4], 128  }
 0x370   :  { %840 = vsyncadd [#allocation4], 4294967168 }
 0x371   :  { %487 = vsyncpa [#allocation3], 1 }
 0x372   :  { %488 = vsyncpa [#allocation6], 1 }
 0x373   :  { %489 = vsyncpa [#allocation9], 1 }
 0x374   :  { %490 = vsyncpa [#allocation4], 1 }

</bundles_post_ra>
